<compile_context>
chip_gen: v7x
topology: tpu7x:2x2x1
jax: 0.10.0
libtpu: 0.0.40
codegen_flags: <defaults>
</compile_context>

<pallas_src>
import functools

import jax
import jax.numpy as jnp
from jax.experimental import pallas as pl
from jax.experimental.pallas import tpu as pltpu


def _round_up(x, m):
    return (x + m - 1) // m * m


# ------------------------------ fused kernel ------------------------------

def _make_asnet_kernel(Bblk, Cout, N, compute_dtype):
    """One grid step = one batch block of Bblk samples.

    Refs:
      x_ref    : [Bblk, Kin, N]   im2col slab (+ ones row) per sample
      wconv_ref: [Cout, Kin]      conv taps, last column = bias
      w3_ref   : [F, D]           AS weight (F = Cout*N, rows in NCHW-flatten order)
      whe1_ref : [D, C_pad]       PCE columns for He1(y) = y
      whe2_ref : [D, C_pad]       PCE columns for He2(y) = y^2 - 1
      pce0_ref : [1, C_pad]       PCE column for He0 = 1
      out_ref  : [Bblk, C_pad]
      feat_ref : VMEM scratch [Bblk, F] (compute_dtype)
    """

    def kernel(x_ref, wconv_ref, w3_ref, whe1_ref, whe2_ref, pce0_ref,
               out_ref, feat_ref):
        wconv = wconv_ref[...]                                      # [Cout, Kin]

        # ---- premodel: conv3x3 (+bias) + ReLU, ONE K-dim matmul per sample ----
        # Static unroll over the block; every slice/store below is lane aligned
        # because N = H*W is a multiple of 128.
        for b in range(Bblk):
            act = jnp.dot(wconv, x_ref[b],
                          preferred_element_type=jnp.float32)      # [Cout, N] f32
            act = jnp.maximum(act, 0.0).astype(compute_dtype)       # ReLU in f32, cast once
            # NCHW flatten: feature row b gets lanes [co*N : (co+1)*N] = channel co.
            for co in range(Cout):
                feat_ref[b:b + 1, co * N:(co + 1) * N] = act[co:co + 1, :]

        # ---- AS linear: ONE matmul with batch as the MXU M dimension ----
        y = jnp.dot(feat_ref[...], w3_ref[...],
                    preferred_element_type=jnp.float32)              # [Bblk, D] f32

        # ---- PCE basis (Hermite deg <= 2) + PCE linear, no concatenate ----
        he2 = y * y - 1.0                                            # f32 VPU work
        out = (pce0_ref[...]
               + jnp.dot(y.astype(compute_dtype), whe1_ref[...],
                         preferred_element_type=jnp.float32)
               + jnp.dot(he2.astype(compute_dtype), whe2_ref[...],
                         preferred_element_type=jnp.float32))        # [Bblk, C_pad]
        out_ref[...] = out.astype(out_ref.dtype)

    return kernel


# ------------------------------ wrapper (glue) ------------------------------

def asnet_forward(x, params, *, compute_dtype=jnp.bfloat16, block_b=None):
    """x: [B, Cin, H, W] float32 (NCHW, like the PyTorch module)."""
    conv_w = params["conv_w"]   # [Cout, Cin, 3, 3]   (PyTorch Conv2d layout)
    conv_b = params["conv_b"]   # [Cout]
    as_w = params["as_w"]       # [D, F]              (PyTorch Linear layout: out x in)
    pce_w = params["pce_w"]     # [C, nbasis = 1 + 2*D]

    B, Cin, H, W = x.shape
    Cout = conv_w.shape[0]
    D = as_w.shape[0]
    C = pce_w.shape[0]
    N = H * W                          # conv output positions per channel (lane aligned)
    Kin = 9 * Cin + 1                  # 9 taps x Cin channels + ones row (bias)
    F = Cout * N                       # AS in_features
    C_pad = _round_up(C, 128)          # lane-dense output width

    # Batch block: keep >= 2 grid steps (v7x has 2 TensorCores) and a modest static
    # unroll by default.  For production batches raise block_b (128 fills v5e MXU M,
    # 256 fills v6e/v7x); per-step VMEM stays ~24 KB * block_b + ~0.2 MiB of weights.
    if block_b is None:
        block_b = max(1, min(16, pl.cdiv(B, 2)))
    nsteps = pl.cdiv(B, block_b)
    B_pad = nsteps * block_b

    # ---- activation prep: zero-pad batch+spatial, im2col, append ones (bias) row ----
    xp = jnp.pad(x, ((0, B_pad - B), (0, 0), (1, 1), (1, 1)))
    patches = [xp[:, :, dy:dy + H, dx:dx + W] for dy in range(3) for dx in range(3)]
    slab = jnp.concatenate(patches, axis=1).reshape(B_pad, 9 * Cin, N)
    slab = jnp.concatenate([slab, jnp.ones((B_pad, 1, N), slab.dtype)], axis=1)
    slab = slab.astype(compute_dtype)                                   # [B_pad, Kin, N]

    # ---- weight prep (small, static re-layouts done once at trace time) ----
    # conv taps: wconv[co, (dy*3+dx)*Cin + ci] = conv_w[co, ci, dy, dx]; last col = bias.
    wconv = jnp.transpose(conv_w, (0, 2, 3, 1)).reshape(Cout, 9 * Cin)
    wconv = jnp.concatenate([wconv, conv_b[:, None]], axis=1).astype(compute_dtype)
    # AS weight: rows already match the PyTorch NCHW flatten order (co, h, w) == (co, n).
    w3 = jnp.transpose(as_w).astype(compute_dtype)                      # [F, D]
    # PCE weight columns: [He0 | He1(y_1..y_D) | He2(y_1..y_D)]; split to avoid concat.
    pce_pad = jnp.pad(pce_w, ((0, C_pad - C), (0, 0)))                  # [C_pad, 1+2D]
    pce0 = jnp.transpose(pce_pad[:, 0:1]).astype(jnp.float32)           # [1, C_pad]
    whe1 = jnp.transpose(pce_pad[:, 1:1 + D]).astype(compute_dtype)     # [D, C_pad]
    whe2 = jnp.transpose(pce_pad[:, 1 + D:1 + 2 * D]).astype(compute_dtype)

    kernel = _make_asnet_kernel(block_b, Cout, N, compute_dtype)

    out = pl.pallas_call(
        kernel,
        grid=(nsteps,),
        out_shape=jax.ShapeDtypeStruct((nsteps, block_b, C_pad), jnp.float32),
        in_specs=[
            pl.BlockSpec((block_b, Kin, N), lambda i: (i, 0, 0)),    # im2col slab
            pl.BlockSpec((Cout, Kin), lambda i: (0, 0)),             # conv taps (+bias col)
            pl.BlockSpec((F, D), lambda i: (0, 0)),                  # AS weight
            pl.BlockSpec((D, C_pad), lambda i: (0, 0)),              # PCE He1 columns
            pl.BlockSpec((D, C_pad), lambda i: (0, 0)),              # PCE He2 columns
            pl.BlockSpec((1, C_pad), lambda i: (0, 0)),              # PCE He0 column
        ],
        out_specs=pl.BlockSpec((None, block_b, C_pad), lambda i: (i, 0, 0)),
        scratch_shapes=[pltpu.VMEM((block_b, F), compute_dtype)],
        compiler_params=pltpu.CompilerParams(dimension_semantics=("parallel",)),
    )(slab, wconv, w3, whe1, whe2, pce0)

    # Drop batch padding rows (zero-padded samples produce ReLU(bias)-driven junk) and
    # the lane padding beyond the real class count.
    return out.reshape(B_pad, C_pad)[:B, :C]


# ------------------------------ reference (pure JAX) ------------------------------

def asnet_reference(x, params):
    conv_w, conv_b, as_w, pce_w = (params["conv_w"], params["conv_b"],
                                   params["as_w"], params["pce_w"])
    y = jax.lax.conv_general_dilated(
        x, conv_w, window_strides=(1, 1), padding="SAME",
        dimension_numbers=("NCHW", "OIHW", "NCHW"))
    y = jax.nn.relu(y + conv_b[None, :, None, None])
    feat = y.reshape(y.shape[0], -1)
    z = feat @ as_w.T
    basis = jnp.concatenate([jnp.ones((z.shape[0], 1), z.dtype), z, z * z - 1.0], axis=-1)
    return basis @ pce_w.T


# ----------------------------------- main -----------------------------------

if __name__ == "__main__":
    B, Cin, H, W = 2, 4, 16, 16
    Cout = 8
    F = Cout * H * W          # 2048  (AS in_features)
    D = 32                    # AS out_features
    num_classes = 10
    nbasis = 1 + 2 * D        # 65

    key = jax.random.PRNGKey(0)
    k_x, k_cw, k_cb, k_as, k_pce = jax.random.split(key, 5)

    x = jax.random.normal(k_x, (B, Cin, H, W), jnp.float32)
    params = {
        "conv_w": 0.1 * jax.random.normal(k_cw, (Cout, Cin, 3, 3), jnp.float32),
        "conv_b": 0.1 * jax.random.normal(k_cb, (Cout,), jnp.float32),
        "as_w": 0.05 * jax.random.normal(k_as, (D, F), jnp.float32),
        "pce_w": 0.1 * jax.random.normal(k_pce, (num_classes, nbasis), jnp.float32),
    }

    fwd_f32 = jax.jit(functools.partial(asnet_forward, compute_dtype=jnp.float32))
    fwd_bf16 = jax.jit(functools.partial(asnet_forward, compute_dtype=jnp.bfloat16))

    out_f32 = jax.block_until_ready(fwd_f32(x, params))
    out_bf16 = jax.block_until_ready(fwd_bf16(x, params))

    ref = asnet_reference(x, params)
    assert out_f32.shape == (B, num_classes), out_f32.shape
    assert out_bf16.shape == (B, num_classes), out_bf16.shape
    # f32 compute path: structural exactness vs. the pure-JAX reference.
    assert jnp.allclose(out_f32, ref, rtol=1e-4, atol=1e-4), (out_f32, ref)
    # bf16 fast path: bf16 operands / f32 accumulation -> ~1e-2 abs error at O(1) outputs.
    assert jnp.allclose(out_bf16, ref, rtol=5e-2, atol=5e-2), (out_bf16, ref)

    print("KERNEL_OK")
</pallas_src>

<mosaic_0001>
module attributes {stable_mosaic.version = 11 : i64} {
  func.func @kernel(%arg0: i32, %arg1: memref<1x37x256xf32, #tpu.memory_space<vmem>>, %arg2: memref<8x37xf32, #tpu.memory_space<vmem>>, %arg3: memref<2048x32xf32, #tpu.memory_space<vmem>>, %arg4: memref<32x128xf32, #tpu.memory_space<vmem>>, %arg5: memref<32x128xf32, #tpu.memory_space<vmem>>, %arg6: memref<1x128xf32, #tpu.memory_space<vmem>>, %arg7: memref<1x1x128xf32, #tpu.memory_space<vmem>>, %arg8: memref<1x2048xf32, #tpu.memory_space<vmem>>) attributes {dimension_semantics = [#tpu.dimension_semantics<parallel>], iteration_bounds = array<i64: 2>, scalar_prefetch = 0 : i64, scratch_operands = 1 : i64, tpu.core_type = #tpu.core_type<tc>, window_params = [{transform_indices = @transform_0, window_bounds = array<i64: 1, 37, 256>}, {pipeline_mode = #tpu.pipeline_mode<synchronous>, transform_indices = @transform_1, window_bounds = array<i64: 8, 37>}, {pipeline_mode = #tpu.pipeline_mode<synchronous>, transform_indices = @transform_2, window_bounds = array<i64: 2048, 32>}, {pipeline_mode = #tpu.pipeline_mode<synchronous>, transform_indices = @transform_3, window_bounds = array<i64: 32, 128>}, {pipeline_mode = #tpu.pipeline_mode<synchronous>, transform_indices = @transform_4, window_bounds = array<i64: 32, 128>}, {pipeline_mode = #tpu.pipeline_mode<synchronous>, transform_indices = @transform_5, window_bounds = array<i64: 1, 128>}, {transform_indices = @transform_6, window_bounds = array<i64: 1, 1, 128>}]} {
    %c0 = arith.constant 0 : index
    %c0_0 = arith.constant 0 : index
    %0 = vector.load %arg2[%c0, %c0_0] : memref<8x37xf32, #tpu.memory_space<vmem>>, vector<8x37xf32>
    %c0_1 = arith.constant 0 : index
    %c0_2 = arith.constant 0 : index
    %c0_3 = arith.constant 0 : index
    %1 = vector.load %arg1[%c0_1, %c0_2, %c0_3] : memref<1x37x256xf32, #tpu.memory_space<vmem>>, vector<1x37x256xf32>
    %2 = vector.shape_cast %1 : vector<1x37x256xf32> to vector<37x256xf32>
    %cst = arith.constant dense<0.000000e+00> : vector<8x256xf32>
    %3 = tpu.matmul %0, %2, %cst {dimension_numbers = #tpu.dot_dimension_numbers<[1], [0], [0], [1], [0, 0, 1, 1], [], []>} : vector<8x37xf32>, vector<37x256xf32>, vector<8x256xf32> -> vector<8x256xf32>
    %cst_4 = arith.constant 0.000000e+00 : f32
    %4 = vector.broadcast %cst_4 : f32 to vector<8x256xf32>
    %5 = arith.maximumf %3, %4 : vector<8x256xf32>
    %6 = vector.extract_strided_slice %5 {offsets = [0, 0], sizes = [1, 256], strides = [1, 1]} : vector<8x256xf32> to vector<1x256xf32>
    %c0_5 = arith.constant 0 : index
    %c0_6 = arith.constant 0 : index
    %7 = vector.load %arg8[%c0_5, %c0_6] : memref<1x2048xf32, #tpu.memory_space<vmem>>, vector<1x256xf32>
    tpu.vector_store %arg8[%c0_5, %c0_6], %6 {strides = array<i32>} : memref<1x2048xf32, #tpu.memory_space<vmem>>, vector<1x256xf32>,
    %8 = vector.extract_strided_slice %5 {offsets = [1, 0], sizes = [1, 256], strides = [1, 1]} : vector<8x256xf32> to vector<1x256xf32>
    %c0_7 = arith.constant 0 : index
    %c256 = arith.constant 256 : index
    %9 = vector.load %arg8[%c0_7, %c256] : memref<1x2048xf32, #tpu.memory_space<vmem>>, vector<1x256xf32>
    tpu.vector_store %arg8[%c0_7, %c256], %8 {strides = array<i32>} : memref<1x2048xf32, #tpu.memory_space<vmem>>, vector<1x256xf32>,
    %10 = vector.extract_strided_slice %5 {offsets = [2, 0], sizes = [1, 256], strides = [1, 1]} : vector<8x256xf32> to vector<1x256xf32>
    %c0_8 = arith.constant 0 : index
    %c512 = arith.constant 512 : index
    %11 = vector.load %arg8[%c0_8, %c512] : memref<1x2048xf32, #tpu.memory_space<vmem>>, vector<1x256xf32>
    tpu.vector_store %arg8[%c0_8, %c512], %10 {strides = array<i32>} : memref<1x2048xf32, #tpu.memory_space<vmem>>, vector<1x256xf32>,
    %12 = vector.extract_strided_slice %5 {offsets = [3, 0], sizes = [1, 256], strides = [1, 1]} : vector<8x256xf32> to vector<1x256xf32>
    %c0_9 = arith.constant 0 : index
    %c768 = arith.constant 768 : index
    %13 = vector.load %arg8[%c0_9, %c768] : memref<1x2048xf32, #tpu.memory_space<vmem>>, vector<1x256xf32>
    tpu.vector_store %arg8[%c0_9, %c768], %12 {strides = array<i32>} : memref<1x2048xf32, #tpu.memory_space<vmem>>, vector<1x256xf32>,
    %14 = vector.extract_strided_slice %5 {offsets = [4, 0], sizes = [1, 256], strides = [1, 1]} : vector<8x256xf32> to vector<1x256xf32>
    %c0_10 = arith.constant 0 : index
    %c1024 = arith.constant 1024 : index
    %15 = vector.load %arg8[%c0_10, %c1024] : memref<1x2048xf32, #tpu.memory_space<vmem>>, vector<1x256xf32>
    tpu.vector_store %arg8[%c0_10, %c1024], %14 {strides = array<i32>} : memref<1x2048xf32, #tpu.memory_space<vmem>>, vector<1x256xf32>,
    %16 = vector.extract_strided_slice %5 {offsets = [5, 0], sizes = [1, 256], strides = [1, 1]} : vector<8x256xf32> to vector<1x256xf32>
    %c0_11 = arith.constant 0 : index
    %c1280 = arith.constant 1280 : index
    %17 = vector.load %arg8[%c0_11, %c1280] : memref<1x2048xf32, #tpu.memory_space<vmem>>, vector<1x256xf32>
    tpu.vector_store %arg8[%c0_11, %c1280], %16 {strides = array<i32>} : memref<1x2048xf32, #tpu.memory_space<vmem>>, vector<1x256xf32>,
    %18 = vector.extract_strided_slice %5 {offsets = [6, 0], sizes = [1, 256], strides = [1, 1]} : vector<8x256xf32> to vector<1x256xf32>
    %c0_12 = arith.constant 0 : index
    %c1536 = arith.constant 1536 : index
    %19 = vector.load %arg8[%c0_12, %c1536] : memref<1x2048xf32, #tpu.memory_space<vmem>>, vector<1x256xf32>
    tpu.vector_store %arg8[%c0_12, %c1536], %18 {strides = array<i32>} : memref<1x2048xf32, #tpu.memory_space<vmem>>, vector<1x256xf32>,
    %20 = vector.extract_strided_slice %5 {offsets = [7, 0], sizes = [1, 256], strides = [1, 1]} : vector<8x256xf32> to vector<1x256xf32>
    %c0_13 = arith.constant 0 : index
    %c1792 = arith.constant 1792 : index
    %21 = vector.load %arg8[%c0_13, %c1792] : memref<1x2048xf32, #tpu.memory_space<vmem>>, vector<1x256xf32>
    tpu.vector_store %arg8[%c0_13, %c1792], %20 {strides = array<i32>} : memref<1x2048xf32, #tpu.memory_space<vmem>>, vector<1x256xf32>,
    %c0_14 = arith.constant 0 : index
    %c0_15 = arith.constant 0 : index
    %22 = vector.load %arg8[%c0_14, %c0_15] : memref<1x2048xf32, #tpu.memory_space<vmem>>, vector<1x2048xf32>
    %c0_16 = arith.constant 0 : index
    %c0_17 = arith.constant 0 : index
    %23 = vector.load %arg3[%c0_16, %c0_17] : memref<2048x32xf32, #tpu.memory_space<vmem>>, vector<2048x32xf32>
    %cst_18 = arith.constant dense<0.000000e+00> : vector<1x32xf32>
    %24 = tpu.matmul %22, %23, %cst_18 {dimension_numbers = #tpu.dot_dimension_numbers<[1], [0], [0], [1], [0, 0, 1, 1], [], []>} : vector<1x2048xf32>, vector<2048x32xf32>, vector<1x32xf32> -> vector<1x32xf32>
    %25 = arith.mulf %24, %24 : vector<1x32xf32>
    %cst_19 = arith.constant 1.000000e+00 : f32
    %26 = vector.broadcast %cst_19 : f32 to vector<1x32xf32>
    %27 = arith.subf %25, %26 : vector<1x32xf32>
    %c0_20 = arith.constant 0 : index
    %c0_21 = arith.constant 0 : index
    %28 = vector.load %arg6[%c0_20, %c0_21] : memref<1x128xf32, #tpu.memory_space<vmem>>, vector<1x128xf32>
    %c0_22 = arith.constant 0 : index
    %c0_23 = arith.constant 0 : index
    %29 = vector.load %arg4[%c0_22, %c0_23] : memref<32x128xf32, #tpu.memory_space<vmem>>, vector<32x128xf32>
    %cst_24 = arith.constant dense<0.000000e+00> : vector<1x128xf32>
    %30 = tpu.matmul %24, %29, %cst_24 {dimension_numbers = #tpu.dot_dimension_numbers<[1], [0], [0], [1], [0, 0, 1, 1], [], []>} : vector<1x32xf32>, vector<32x128xf32>, vector<1x128xf32> -> vector<1x128xf32>
    %31 = arith.addf %28, %30 : vector<1x128xf32>
    %c0_25 = arith.constant 0 : index
    %c0_26 = arith.constant 0 : index
    %32 = vector.load %arg5[%c0_25, %c0_26] : memref<32x128xf32, #tpu.memory_space<vmem>>, vector<32x128xf32>
    %cst_27 = arith.constant dense<0.000000e+00> : vector<1x128xf32>
    %33 = tpu.matmul %27, %32, %cst_27 {dimension_numbers = #tpu.dot_dimension_numbers<[1], [0], [0], [1], [0, 0, 1, 1], [], []>} : vector<1x32xf32>, vector<32x128xf32>, vector<1x128xf32> -> vector<1x128xf32>
    %34 = arith.addf %31, %33 : vector<1x128xf32>
    %c0_28 = arith.constant 0 : index
    %c0_29 = arith.constant 0 : index
    %c0_30 = arith.constant 0 : index
    %35 = vector.load %arg7[%c0_28, %c0_29, %c0_30] : memref<1x1x128xf32, #tpu.memory_space<vmem>>, vector<1x1x128xf32>
    %36 = vector.shape_cast %35 : vector<1x1x128xf32> to vector<1x128xf32>
    %37 = vector.shape_cast %34 : vector<1x128xf32> to vector<1x1x128xf32>
    tpu.vector_store %arg7[%c0_28, %c0_29, %c0_30], %37 {strides = array<i32>} : memref<1x1x128xf32, #tpu.memory_space<vmem>>, vector<1x1x128xf32>,
    return
  }
  func.func @transform_0(%arg0: i32) -> (i32, i32, i32) {
    %c0_i32 = arith.constant 0 : i32
    %c0_i32_0 = arith.constant 0 : i32
    %c0_i32_1 = arith.constant 0 : i32
    return %arg0, %c0_i32, %c0_i32_0 : i32, i32, i32
  }
  func.func @transform_1(%arg0: i32) -> (i32, i32) {
    %c0_i32 = arith.constant 0 : i32
    %c0_i32_0 = arith.constant 0 : i32
    %c0_i32_1 = arith.constant 0 : i32
    return %c0_i32, %c0_i32_0 : i32, i32
  }
  func.func @transform_2(%arg0: i32) -> (i32, i32) {
    %c0_i32 = arith.constant 0 : i32
    %c0_i32_0 = arith.constant 0 : i32
    %c0_i32_1 = arith.constant 0 : i32
    return %c0_i32, %c0_i32_0 : i32, i32
  }
  func.func @transform_3(%arg0: i32) -> (i32, i32) {
    %c0_i32 = arith.constant 0 : i32
    %c0_i32_0 = arith.constant 0 : i32
    %c0_i32_1 = arith.constant 0 : i32
    return %c0_i32, %c0_i32_0 : i32, i32
  }
  func.func @transform_4(%arg0: i32) -> (i32, i32) {
    %c0_i32 = arith.constant 0 : i32
    %c0_i32_0 = arith.constant 0 : i32
    %c0_i32_1 = arith.constant 0 : i32
    return %c0_i32, %c0_i32_0 : i32, i32
  }
  func.func @transform_5(%arg0: i32) -> (i32, i32) {
    %c0_i32 = arith.constant 0 : i32
    %c0_i32_0 = arith.constant 0 : i32
    %c0_i32_1 = arith.constant 0 : i32
    return %c0_i32, %c0_i32_0 : i32, i32
  }
  func.func @transform_6(%arg0: i32) -> (i32, i32, i32) {
    %c0_i32 = arith.constant 0 : i32
    %c0_i32_0 = arith.constant 0 : i32
    %c0_i32_1 = arith.constant 0 : i32
    return %arg0, %c0_i32, %c0_i32_0 : i32, i32, i32
  }
}

</mosaic_0001>

<bundles_post_ra>
// kernel: asnet_forward.1
= control target key start
LH: loop header
LB: loop body
LE: loop exit
PB: predicated region body
PF: predicated region fallthrough
CT: control target
= control target key end

     0   :  { %11 = vsyncpa [#allocation4], 0  ;;  %s3289_s0 = inlined_call_operand.vmem [shape: f32[2,37,256], index: 0, kind: input, shape index: {}]   ;;  %s3290_s1 = inlined_call_operand.vmem [shape: f32[8,37], index: 1, kind: input, shape index: {}]   ;;  %s3291_s2 = inlined_call_operand.vmem [shape: f32[2048,32], index: 2, kind: input, shape index: {}]   ;;  %s3292_s3 = inlined_call_operand.vmem [shape: f32[32,128], index: 3, kind: input, shape index: {}]   ;;  %s3293_s4 = inlined_call_operand.vmem [shape: f32[32,128], index: 4, kind: input, shape index: {}]   ;;  %s3294_s5 = inlined_call_operand.vmem [shape: f32[1,128], index: 5, kind: input, shape index: {}]   ;;  %s3295_s6 = inlined_call_operand.hbm [shape: f32[2,1,128], index: 6, kind: output, shape index: {}]  }
   0x1   :  { %13 = vsyncpa [#allocation4 + $0x1], 0  ;;  %s2298_s21 = smov 0   ;;  %s2300_s22 = smov 0  }
   0x2   :  { %s2302_s23 = smov 0   ;;  %s2304_s24 = smov 0  }
   0x3 LB: > { %s2319_s25 = sadd.s32 4294967295, %s2256_s24   ;;  %s1545_s26 = sadd.s32 4294967294, %s2256_s24   ;;  %s2256_s24 = sphi %s2304_s24, %s3303_s24   ;;  %s2252_s23 = sphi %s2302_s23, %s3302_s23   ;;  %s2248_s22 = sphi %s2300_s22, %s3301_s22   ;;  %s2244_s21 = sphi %s2298_s21, %s3300_s21  }
   0x4   : > { %s2323_s27 = sadd.s32 1, %s2256_s24   ;;  %s157_s28 = sadd.s32 1, %s2252_s23 }
   0x5   : > { %s154_s29 = ssub.s32 %s2256_s24, %s2323_s27  ;;  %p167_p0 = scmp.ne.s32.totalorder %s2252_s23, %s2248_s22 }
   0x6   : > { %p155_p1 = scmp.eq.s32.totalorder %s154_s29, 0  ;;  %p168_p2 = scmp.eq.s32.totalorder %s2319_s25, 1 }
   0x7   : > { %p173_p3 = scmp.ne.s32.totalorder %s2248_s22, %s2244_s21  ;;  %p174_p4 = scmp.eq.s32.totalorder %s1545_s26, 1 }
   0x8   : > { %s2334_s30 = scalar_select %p155_p1, %s2252_s23, %s157_s28  }
   0x9   : > { %p2336_p5 = por %p168_p2, %p167_p0  ;;  %p2340_p6 = por %p174_p4, %p173_p3 }
   0xa   : > { %p1548_p7 = scmp.ge.s32.totalorder %s2256_s24, 1  ;;  %p215_p8 = scmp.lt.s32.totalorder %s2256_s24, 3 }
   0xc   : > { %p216_p9 = pnand %p1548_p7, %p215_p8 }
   0xd   : > { %p244_p10 = scmp.lt.s32.totalorder (!%p216_p9), %s2319_s25, 1  ;;  %v434_v0 = vld [vmem:[%s3291_s2 + $0x80] sm:$0xff] (!%p216_p9)  ;;  %v2258_v1 = vmov (!%p216_p9), 0.0   ;;  %v435_v2 = vld [vmem:[%s3291_s2 + $0x88] sm:$0xff] (!%p216_p9)  ;;  %v436_v7 = vld [vmem:[%s3291_s2 + $0x90] sm:$0xff] (!%p216_p9)  ;;  %vm264_vm0 = vcmask (!%p216_p9), 1044480  }
   0xe   : > { %219 = sbr.rel (%p216_p9) target bundleno = 826 (0x33a), region = 44  ;;  %335 = vmatprep.mubr.f32.mxu0 (!%p216_p9), %v2258_v1  ;;  %v1879_v3 = vpack.c.bf16 (!%p216_p9), %v435_v2, %v434_v0  ;;  %v418_v4 = vld [vmem:[%s3291_s2] sm:$0xff] (!%p216_p9)  ;;  %v419_v5 = vld [vmem:[%s3291_s2 + $0x8] sm:$0xff] (!%p216_p9)  ;;  %v437_v8 = vld [vmem:[%s3291_s2 + $0x98] sm:$0xff] (!%p216_p9)  ;;  %vm260_vm1 = vcmask (!%p216_p9), 302080   ;;  %vm2261_vm3 = vmmov (!%p216_p9), 0  }
   0xf   : > { %v1881_v6 = vpack.c.bf16 (!%p216_p9), %v419_v5, %v418_v4  ;;  %v1883_v9 = vpack.c.bf16 (!%p216_p9), %v437_v8, %v436_v7  ;;  %v420_v10 = vld [vmem:[%s3291_s2 + $0x10] sm:$0xff] (!%p216_p9)  ;;  %v421_v11 = vld [vmem:[%s3291_s2 + $0x18] sm:$0xff] (!%p216_p9)  ;;  %v466_v26 = vld [vmem:[%s3291_s2 + $0x180] sm:$0xff] (!%p216_p9)  ;;  %vm1323_vm4 = vcmask (!%p216_p9), 261120   ;;  %s242_s19 = sand.u32 (!%p216_p9), 1, %s2248_s22  }
  0x10   : > { %1880 = vmatprep.subr.bf16.mxu1 (!%p216_p9), %v1879_v3  ;;  %v1885_v12 = vpack.c.bf16 (!%p216_p9), %v421_v11, %v420_v10  ;;  %v467_v27 = vld [vmem:[%s3291_s2 + $0x188] sm:$0xff] (!%p216_p9)  ;;  %v450_v28 = vld [vmem:[%s3291_s2 + $0x100] sm:$0xff] (!%p216_p9)  ;;  %v468_v30 = vld [vmem:[%s3291_s2 + $0x190] sm:$0xff] (!%p216_p9)  ;;  %s243_s29 = scalar_lea.vmem (!%p216_p9), [#allocation3], %s242_s19  ;;  %s1478_s14 = scalar_lea.sflag (!%p216_p9), [#allocation4], %s242_s19 }
  0x11   : > { %1882 = vmatpush3.bf16.msra.mxu1 (!%p216_p9), %v1881_v6  ;;  %v451_v29 = vld [vmem:[%s3291_s2 + $0x108] sm:$0xff] (!%p216_p9)  ;;  %v469_v31 = vld [vmem:[%s3291_s2 + $0x198] sm:$0xff] (!%p216_p9)  ;;  %v1911_v33 = vpack.c.bf16 (!%p216_p9), %v467_v27, %v466_v26  ;;  %v249_v34 = vld [vmem:[%s3290_s1] sm:$0xff] (!%p216_p9)  ;;  %s1490_s9 = sshll.u32 (!%p216_p9), %s243_s29, 4  ;;  %s3249_s9 = int_to_ptr.vmem [resolvable:$true] %s1490_s9 }
  0x12   : > { %1884 = vmatprep.subr.bf16.mxu1 (!%p216_p9), %v1883_v9  ;;  %v1913_v35 = vpack.c.bf16 (!%p216_p9), %v451_v29, %v450_v28  ;;  %v1915_v36 = vpack.c.bf16 (!%p216_p9), %v469_v31, %v468_v30  ;;  %v452_v37 = vld [vmem:[%s3291_s2 + $0x110] sm:$0xff] (!%p216_p9)  ;;  %v453_v38 = vld [vmem:[%s3291_s2 + $0x118] sm:$0xff] (!%p216_p9)  ;;  %v438_v40 = vld [vmem:[%s3291_s2 + $0xa0] sm:$0xff] (!%p216_p9) }
  0x13   : > { %v1917_v39 = vpack.c.bf16 (!%p216_p9), %v453_v38, %v452_v37  ;;  %v439_v41 = vld [vmem:[%s3291_s2 + $0xa8] sm:$0xff] (!%p216_p9)  ;;  %v470_v42 = vld [vmem:[%s3291_s2 + $0x1a0] sm:$0xff] (!%p216_p9)  ;;  %v440_v52 = vld [vmem:[%s3291_s2 + $0xb0] sm:$0xff] (!%p216_p9) }
  0x14   : > { %v1887_v43 = vpack.c.bf16 (!%p216_p9), %v439_v41, %v438_v40  ;;  %v471_v44 = vld [vmem:[%s3291_s2 + $0x1a8] sm:$0xff] (!%p216_p9)  ;;  %v422_v45 = vld [vmem:[%s3291_s2 + $0x20] sm:$0xff] (!%p216_p9)  ;;  %v441_v53 = vld [vmem:[%s3291_s2 + $0xb8] sm:$0xff] (!%p216_p9) }
  0x15   : > { %s245_s13 = scalar_select %p244_p10, %s2319_s25, 1  ;;  %1886 = vmatpush3.bf16.msra.mxu1 %v1885_v12  ;;  %v423_v46 = vld [vmem:[%s3291_s2 + $0x28] sm:$0xff]  ;;  %v1919_v47 = vpack.c.bf16 %v471_v44, %v470_v42  ;;  %v454_v49 = vld [vmem:[%s3291_s2 + $0x120] sm:$0xff]  ;;  %v472_v54 = vld [vmem:[%s3291_s2 + $0x1b0] sm:$0xff]  ;;  %v1891_v55 = vpack.c.bf16 %v441_v53, %v440_v52 }
  0x16   : > { %v1889_v48 = vpack.c.bf16 %v423_v46, %v422_v45  ;;  %v455_v50 = vld [vmem:[%s3291_s2 + $0x128] sm:$0xff]  ;;  %1888 = vmatprep.subr.bf16.mxu1 %v1887_v43  ;;  %v473_v56 = vld [vmem:[%s3291_s2 + $0x1b8] sm:$0xff]  ;;  %v424_v57 = vld [vmem:[%s3291_s2 + $0x30] sm:$0xff] }
  0x17   : > { %s2150_s28 = smul.u32 80, %s245_s13  ;;  %v1921_v51 = vpack.c.bf16 %v455_v50, %v454_v49  ;;  %v425_v58 = vld [vmem:[%s3291_s2 + $0x38] sm:$0xff]  ;;  %v1923_v59 = vpack.c.bf16 %v473_v56, %v472_v54  ;;  %v456_v61 = vld [vmem:[%s3291_s2 + $0x130] sm:$0xff]  ;;  %v442_v0 = vld [vmem:[%s3291_s2 + $0xc0] sm:$0xff]  ;;  %s2194_s13 = scalar_lea.vmem %s3249_s9, 16 }
  0x18   : > { %v1893_v60 = vpack.c.bf16 %v425_v58, %v424_v57  ;;  %v457_v62 = vld [vmem:[%s3291_s2 + $0x138] sm:$0xff]  ;;  %v443_v2 = vld [vmem:[%s3291_s2 + $0xc8] sm:$0xff]  ;;  %v474_v3 = vld [vmem:[%s3291_s2 + $0x1c0] sm:$0xff]  ;;  %v350_v57 = vlaneseq  ;;  %p2195_p11 = scmp.ne.s32.totalorder %s3249_s9, %s2194_s13 }
  0x19   : > { %s248_s15 = scalar_lea.vmem %s3289_s0, %s2150_s28  ;;  %1890 = vmatpush3.bf16.msra.mxu1 %v1889_v48  ;;  %v1925_v63 = vpack.c.bf16 %v457_v62, %v456_v61  ;;  %v1895_v4 = vpack.c.bf16 %v443_v2, %v442_v0  ;;  %v475_v5 = vld [vmem:[%s3291_s2 + $0x1c8] sm:$0xff]  ;;  %v426_v6 = vld [vmem:[%s3291_s2 + $0x40] sm:$0xff]  ;;  %v449_v38 = vld [vmem:[%s3291_s2 + $0xf8] sm:$0xff]  ;;  %s1556_s28 = sshll.u32 %s2319_s25, 4 }
  0x1a   : > { %v251_v13 = vld [vmem:[%s248_s15 + $0x8] sm:$0xff]  ;;  %v253_v14 = vld [vmem:[%s248_s15 + $0x18] sm:$0xff]  ;;  %v250_v15 = vld [vmem:[%s248_s15] sm:$0xff]  ;;  %1892 = vmatprep.subr.bf16.mxu1 %v1891_v55  ;;  %v1927_v8 = vpack.c.bf16 %v475_v5, %v474_v3  ;;  %v2259_v55 = vmov 1966171168   ;;  %vm2564_vm2 = vcmp.lt.s32.totalorder %v350_v57, 256  ;;  %s3247_s12 = scalar_lea.hbm %s3295_s6, %s1556_s28  ;;  %p2196_p12 = pnand %p2195_p11, %p2336_p5 }
  0x1b   : > { %v1871_v16 = vpack.c.bf16 %v253_v14, %v251_v13  ;;  %v252_v17 = vld [vmem:[%s248_s15 + $0x10] sm:$0xff]  ;;  %v255_v18 = vld [vmem:[%s248_s15 + $0x28] sm:$0xff]  ;;  %v257_v19 = vld [vmem:[%s248_s15 + $0x38] sm:$0xff]  ;;  %v348_v56 = vunpack.c.l.s4 %v2259_v55  ;;  %s2262_s25 = smov [#allocation3]  }
  0x1c   : > { %v1873_v20 = vpack.c.bf16 %v252_v17, %v250_v15  ;;  %v1875_v21 = vpack.c.bf16 %v257_v19, %v255_v18  ;;  %v254_v22 = vld [vmem:[%s248_s15 + $0x20] sm:$0xff]  ;;  %v256_v23 = vld [vmem:[%s248_s15 + $0x30] sm:$0xff]  ;;  %v259_v25 = vld [vmem:[%s248_s15 + $0x48] sm:$0x1f]  ;;  %p2197_p13 = pneg %p2196_p12  ;;  %s2198_s16 = sshll.u32 %s2262_s25, 4  ;;  %s2199_s16 = int_to_ptr.vmem [resolvable:$false] %s2198_s16 }
  0x1d   : > { %1872 = vmatprep.subr.bf16.mxu0 %v1871_v16  ;;  %v1877_v24 = vpack.c.bf16 %v256_v23, %v254_v22  ;;  %v258_v32 = vld [vmem:[%s248_s15 + $0x40] sm:$0x1f]  ;;  %1894 = vmatpush3.bf16.msra.mxu1 %v1893_v60  ;;  %v427_v7 = vld [vmem:[%s3291_s2 + $0x48] sm:$0xff]  ;;  %v444_v13 = vld [vmem:[%s3291_s2 + $0xd0] sm:$0xff]  ;;  %v349_v58 = vunpack.c.0.s8 %v348_v56  ;;  %s2200_s17 = scalar_lea.vmem %s2199_s16, 32  ;;  %p2201_p0 = scmp.lt.s32.totalorder %s3249_s9, %s2199_s16 }
  0x1e   : > { %1874 = vmatpush1.bf16.msra.mxu0 %v1873_v20  ;;  %v1897_v9 = vpack.c.bf16 %v427_v7, %v426_v6  ;;  %v458_v10 = vld [vmem:[%s3291_s2 + $0x140] sm:$0xff]  ;;  %v459_v11 = vld [vmem:[%s3291_s2 + $0x148] sm:$0xff]  ;;  %1896 = vmatprep.subr.bf16.mxu1 %v1895_v4  ;;  %v445_v14 = vld [vmem:[%s3291_s2 + $0xd8] sm:$0xff]  ;;  %p2202_p1 = scmp.lt.s32.totalorder %s2200_s17, %s2194_s13 }
  0x1f   : > { %1876 = vmatprep.subr.bf16.mxu0 %v1875_v21  ;;  %v1929_v12 = vpack.c.bf16 %v459_v11, %v458_v10  ;;  %v476_v15 = vld [vmem:[%s3291_s2 + $0x1d0] sm:$0xff]  ;;  %v1899_v16 = vpack.c.bf16 %v445_v14, %v444_v13  ;;  %v477_v17 = vld [vmem:[%s3291_s2 + $0x1d8] sm:$0xff]  ;;  %v447_v26 = vld [vmem:[%s3291_s2 + $0xe8] sm:$0xff] }
  0x20   : > { %v428_v18 = vld [vmem:[%s3291_s2 + $0x50] sm:$0xff]  ;;  %v429_v19 = vld [vmem:[%s3291_s2 + $0x58] sm:$0xff]  ;;  %v1931_v20 = vpack.c.bf16 %v477_v17, %v476_v15  ;;  %v478_v27 = vld [vmem:[%s3291_s2 + $0x1e0] sm:$0xff]  ;;  %p2203_p2 = por %p2202_p1, %p2201_p0 }
  0x21   : > { %1898 = vmatpush3.bf16.msra.mxu1 %v1897_v9  ;;  %v1901_v21 = vpack.c.bf16 %v429_v19, %v428_v18  ;;  %v460_v22 = vld [vmem:[%s3291_s2 + $0x150] sm:$0xff]  ;;  %v461_v23 = vld [vmem:[%s3291_s2 + $0x158] sm:$0xff]  ;;  %v479_v29 = vld [vmem:[%s3291_s2 + $0x1e8] sm:$0xff] }
  0x22   : > { %1878 = vmatpush1.bf16.msra.mxu0 %v1877_v24  ;;  %1900 = vmatprep.subr.bf16.mxu1 %v1899_v16  ;;  %v1933_v24 = vpack.c.bf16 %v461_v23, %v460_v22  ;;  %v430_v30 = vld [vmem:[%s3291_s2 + $0x60] sm:$0xff]  ;;  %v431_v31 = vld [vmem:[%s3291_s2 + $0x68] sm:$0xff]  ;;  %v481_v40 = vld [vmem:[%s3291_s2 + $0x1f8] sm:$0xff]  ;;  %p2204_p3 = pnand %p2203_p2, %p2197_p13 }
  0x23   : > { %1550 = vmatprep.subr.msk.mxu0 %vm264_vm0, %v259_v25  ;;  %v446_v25 = vld [vmem:[%s3291_s2 + $0xe0] sm:$0xff]  ;;  %v432_v43 = vld [vmem:[%s3291_s2 + $0x70] sm:$0xff]  ;;  %v433_v44 = vld [vmem:[%s3291_s2 + $0x78] sm:$0xff] }
  0x24   : > { %v1903_v28 = vpack.c.bf16 %v447_v26, %v446_v25  ;;  %v464_v45 = vld [vmem:[%s3291_s2 + $0x170] sm:$0xff]  ;;  %v1909_v46 = vpack.c.bf16 %v433_v44, %v432_v43  ;;  %v498_v49 = vld [vmem:[%s3291_s2 + $0x280] sm:$0xff]  ;;  %v499_v50 = vld [vmem:[%s3291_s2 + $0x288] sm:$0xff] }
  0x25   : > { %1902 = vmatpush3.bf16.msra.mxu1 %v1901_v21  ;;  %v1943_v52 = vpack.c.bf16 %v499_v50, %v498_v49  ;;  %v531_v53 = vld [vmem:[%s3291_s2 + $0x388] sm:$0xff]  ;;  %v482_v18 = vld [vmem:[%s3291_s2 + $0x200] sm:$0xff]  ;;  %v500_v26 = vld [vmem:[%s3291_s2 + $0x290] sm:$0xff] }
  0x26   : > { %1551 = vmatpush1.msk.msra.mxu0 %vm264_vm0, %v258_v32  ;;  %v1935_v32 = vpack.c.bf16 %v479_v29, %v478_v27  ;;  %1904 = vmatprep.subr.bf16.mxu1 %v1903_v28  ;;  %v483_v22 = vld [vmem:[%s3291_s2 + $0x208] sm:$0xff]  ;;  %v514_v23 = vld [vmem:[%s3291_s2 + $0x300] sm:$0xff]  ;;  %v501_v27 = vld [vmem:[%s3291_s2 + $0x298] sm:$0xff] }
  0x27   : > { %1552 = vmatmul.mubr.msk.f32.vlgmr.msra.gmra.mrb[0].mxu0 %vm260_vm1, %v249_v34  ;;  %1912 = vmatprep.subr.bf16.mxu0 %v1911_v33  ;;  %v1905_v33 = vpack.c.bf16 %v431_v31, %v430_v30  ;;  %v462_v34 = vld [vmem:[%s3291_s2 + $0x160] sm:$0xff]  ;;  %v1945_v29 = vpack.c.bf16 %v483_v22, %v482_v18  ;;  %v535_v49 = vld [vmem:[%s3291_s2 + $0x3a8] sm:$0xff]  ;;  %v489_v6 = vld [vmem:[%s3291_s2 + $0x238] sm:$0xff] }
  0x28   : > { %1914 = vmatpush3.bf16.msra.mxu0 %v1913_v35  ;;  %v463_v35 = vld [vmem:[%s3291_s2 + $0x168] sm:$0xff]  ;;  %v502_v43 = vld [vmem:[%s3291_s2 + $0x2a0] sm:$0xff] }
  0x29   : > { %1916 = vmatprep.subr.bf16.mxu0 %v1915_v36  ;;  %v448_v36 = vld [vmem:[%s3291_s2 + $0xf0] sm:$0xff]  ;;  %v1937_v37 = vpack.c.bf16 %v463_v35, %v462_v34  ;;  %1906 = vmatpush3.bf16.msra.mxu1 %v1905_v33  ;;  %v533_v33 = vld [vmem:[%s3291_s2 + $0x398] sm:$0xff]  ;;  %v487_v55 = vld [vmem:[%s3291_s2 + $0x228] sm:$0xff] }
  0x2a   : > { %v1907_v41 = vpack.c.bf16 %v449_v38, %v448_v36  ;;  %v490_v18 = vld [vmem:[%s3291_s2 + $0x240] sm:$0xff]  ;;  %v491_v22 = vld [vmem:[%s3291_s2 + $0x248] sm:$0xff] }
  0x2c   : > { %1918 = vmatpush3.bf16.msra.mxu0 %v1917_v39  ;;  %v480_v39 = vld [vmem:[%s3291_s2 + $0x1f0] sm:$0xff]  ;;  %1908 = vmatprep.subr.bf16.mxu1 %v1907_v41 }
  0x2d   : > { %1920 = vmatprep.subr.bf16.mxu0 %v1919_v47  ;;  %v1939_v42 = vpack.c.bf16 %v481_v40, %v480_v39  ;;  %v465_v47 = vld [vmem:[%s3291_s2 + $0x178] sm:$0xff]  ;;  %1910 = vmatpush3.bf16.msra.mxu1 %v1909_v46  ;;  %v484_v39 = vld [vmem:[%s3291_s2 + $0x210] sm:$0xff] }
  0x2e   : > { %v1941_v48 = vpack.c.bf16 %v465_v47, %v464_v45  ;;  %1944 = vmatprep.subr.bf16.mxu1 %v1943_v52  ;;  %v485_v40 = vld [vmem:[%s3291_s2 + $0x218] sm:$0xff]  ;;  %v516_v41 = vld [vmem:[%s3291_s2 + $0x310] sm:$0xff]  ;;  %v1947_v45 = vpack.c.bf16 %v501_v27, %v500_v26  ;;  %v503_v47 = vld [vmem:[%s3291_s2 + $0x2a8] sm:$0xff] }
  0x2f   : > { %v1949_v52 = vpack.c.bf16 %v485_v40, %v484_v39  ;;  %v522_v26 = vld [vmem:[%s3291_s2 + $0x340] sm:$0xff]  ;;  %v523_v27 = vld [vmem:[%s3291_s2 + $0x348] sm:$0xff] }
  0x30   : > { %1922 = vmatpush3.bf16.msra.mxu0 %v1921_v51  ;;  %v530_v51 = vld [vmem:[%s3291_s2 + $0x380] sm:$0xff] }
  0x31   : > { %1924 = vmatprep.subr.bf16.mxu0 %v1923_v59  ;;  %v1975_v54 = vpack.c.bf16 %v531_v53, %v530_v51  ;;  %v2561_v59 = vshrl.u32 %v350_v57, 7  ;;  %v1951_v57 = vpack.c.bf16 %v503_v47, %v502_v43  ;;  %v510_v43 = vld [vmem:[%s3291_s2 + $0x2e0] sm:$0xff]  ;;  %v543_v47 = vld [vmem:[%s3291_s2 + $0x3e8] sm:$0xff] }
  0x33   : > { %v352_v0 = vsub.s32 %v349_v58, %v2561_v59  ;;  %v682_v17 = vsub.s32 1, %v2561_v59  ;;  %v690_v19 = vsub.s32 3, %v2561_v59  ;;  %v686_v21 = vsub.s32 2, %v2561_v59 }
  0x34   : > { %1926 = vmatpush3.bf16.msra.mxu0 %v1925_v63  ;;  %v698_v25 = vsub.s32 5, %v2561_v59  ;;  %v706_v31 = vsub.s32 7, %v2561_v59  ;;  %v702_v34 = vsub.s32 6, %v2561_v59 }
  0x35   : > { %1928 = vmatprep.subr.bf16.mxu0 %v1927_v8 }
  0x38   : > { %1930 = vmatpush3.bf16.msra.mxu0 %v1929_v12 }
  0x39   : > { %1932 = vmatprep.subr.bf16.mxu0 %v1931_v20  ;;  %v678_v20 = vsub.s32 0, %v2561_v59 }
  0x3c   : > { %1934 = vmatpush3.bf16.msra.mxu0 %v1933_v24  ;;  %v515_v24 = vld [vmem:[%s3291_s2 + $0x308] sm:$0xff] }
  0x3d   : > { %1936 = vmatprep.subr.bf16.mxu0 %v1935_v32  ;;  %v1977_v30 = vpack.c.bf16 %v515_v24, %v514_v23  ;;  %v532_v32 = vld [vmem:[%s3291_s2 + $0x390] sm:$0xff] }
  0x3e   : > { %v1979_v46 = vpack.c.bf16 %v533_v33, %v532_v32  ;;  %v540_v32 = vld [vmem:[%s3291_s2 + $0x3d0] sm:$0xff]  ;;  %v541_v33 = vld [vmem:[%s3291_s2 + $0x3d8] sm:$0xff] }
  0x3f   : > { %v1995_v40 = vpack.c.bf16 %v541_v33, %v540_v32 }
  0x40   : > { %1938 = vmatpush3.bf16.msra.mxu0 %v1937_v37 }
  0x41   : > { %1940 = vmatprep.subr.bf16.mxu0 %v1939_v42  ;;  %v517_v42 = vld [vmem:[%s3291_s2 + $0x318] sm:$0xff] }
  0x42   : > { %v1981_v53 = vpack.c.bf16 %v517_v42, %v516_v41  ;;  %v524_v41 = vld [vmem:[%s3291_s2 + $0x350] sm:$0xff]  ;;  %v525_v42 = vld [vmem:[%s3291_s2 + $0x358] sm:$0xff] }
  0x44   : > { %1942 = vmatpush3.bf16.msra.mxu0 %v1941_v48  ;;  %v534_v48 = vld [vmem:[%s3291_s2 + $0x3a0] sm:$0xff] }
  0x45   : > { %1976 = vmatprep.subr.bf16.mxu0 %v1975_v54  ;;  %v486_v54 = vld [vmem:[%s3291_s2 + $0x220] sm:$0xff]  ;;  %v1983_v58 = vpack.c.bf16 %v535_v49, %v534_v48  ;;  %v1997_v49 = vpack.c.bf16 %v525_v42, %v524_v41  ;;  %v567_v42 = vld [vmem:[%s3291_s2 + $0x4a8] sm:$0xff] }
  0x46   : > { %v566_v41 = vld [vmem:[%s3291_s2 + $0x4a0] sm:$0xff] }
  0xfa   : > { %v337_v60 = vpop.f32.mrb[0].mxu0 }
  0xfb   : > { %v342_v61 = vmax.f32 %v337_v60, 0.0  ;;  %v339_v62 = vpop.f32.mrb[1].mxu0  ;;  %v518_v60 = vld [vmem:[%s3291_s2 + $0x320] sm:$0xff] }
  0xfc   : > { %v343_v63 = vmax.f32 %v339_v62, 0.0  ;;  %v504_v62 = vld [vmem:[%s3291_s2 + $0x2b0] sm:$0xff] }
  0xfe   : > { %v346_v2 = vcombine.low %v342_v61, %v343_v63  ;;  %v383_v3 = vcombine.high %v342_v61, %v343_v63  ;;  %v519_v61 = vld [vmem:[%s3291_s2 + $0x328] sm:$0xff]  ;;  %v505_v63 = vld [vmem:[%s3291_s2 + $0x2b8] sm:$0xff] }
 0x100   : > { %v353_v4 = vrot.slane %v346_v2, %v352_v0  ;;  %v390_v5 = vrot.slane %v383_v3, %v352_v0  ;;  %v537_v2 = vld [vmem:[%s3291_s2 + $0x3b8] sm:$0xff]  ;;  %v1953_v3 = vpack.c.bf16 %v487_v55, %v486_v54  ;;  %v526_v54 = vld [vmem:[%s3291_s2 + $0x360] sm:$0xff]  ;;  %v527_v55 = vld [vmem:[%s3291_s2 + $0x368] sm:$0xff] }
 0x102   : > { %v360_v7 = vrot.slane %v353_v4, %v352_v0  ;;  %v367_v8 = vcombine.high %v353_v4, %v353_v4  ;;  %v397_v9 = vrot.slane %v390_v5, %v352_v0  ;;  %v400_v10 = vcombine.high %v390_v5, %v390_v5  ;;  %v488_v5 = vld [vmem:[%s3291_s2 + $0x230] sm:$0xff] }
 0x103   : > { %v1985_v4 = vpack.c.bf16 %v519_v61, %v518_v60  ;;  %v544_v60 = vld [vmem:[%s3291_s2 + $0x3f0] sm:$0xff]  ;;  %v545_v61 = vld [vmem:[%s3291_s2 + $0x3f8] sm:$0xff] }
 0x104   : > { %366 = vst.msk [vmem:[#allocation2] sm:$0x3] %vm2564_vm2, %v360_v7  ;;  %v374_v11 = vrot.slane %v367_v8, %v352_v0  ;;  %v377_v12 = vcombine.high %v360_v7, %v360_v7  ;;  %399 = vst.msk [vmem:[#allocation2 + $0x8] sm:$0x3] %vm2564_vm2, %v397_v9  ;;  %v407_v13 = vrot.slane %v400_v10, %v352_v0  ;;  %v536_v0 = vld [vmem:[%s3291_s2 + $0x3b0] sm:$0xff]  ;;  %v521_v10 = vld [vmem:[%s3291_s2 + $0x338] sm:$0xff] }
 0x105   : > { %v410_v14 = vcombine.high %v397_v9, %v397_v9  ;;  %v1955_v7 = vpack.c.bf16 %v505_v63, %v504_v62  ;;  %v1987_v8 = vpack.c.bf16 %v537_v2, %v536_v0  ;;  %v520_v9 = vld [vmem:[%s3291_s2 + $0x330] sm:$0xff]  ;;  %v2001_v63 = vpack.c.bf16 %v527_v55, %v526_v54  ;;  %v497_v2 = vld [vmem:[%s3291_s2 + $0x278] sm:$0xff] }
 0x106   : > { %376 = vst.msk [vmem:[#allocation2 + $0x2] sm:$0x3] %vm2564_vm2, %v374_v11  ;;  %379 = vst.msk [vmem:[#allocation2 + $0x4] sm:$0x3] %vm2564_vm2, %v377_v12  ;;  %v380_v15 = vcombine.high %v374_v11, %v374_v11  ;;  %v413_v16 = vcombine.high %v407_v13, %v407_v13  ;;  %v506_v11 = vld [vmem:[%s3291_s2 + $0x2c0] sm:$0xff]  ;;  %v507_v12 = vld [vmem:[%s3291_s2 + $0x2c8] sm:$0xff] }
 0x107   : > { %409 = vst.msk [vmem:[#allocation2 + $0xa] sm:$0x3] %vm2564_vm2, %v407_v13  ;;  %412 = vst.msk [vmem:[#allocation2 + $0xc] sm:$0x3] %vm2564_vm2, %v410_v14  ;;  %v538_v13 = vld [vmem:[%s3291_s2 + $0x3c0] sm:$0xff]  ;;  %v539_v14 = vld [vmem:[%s3291_s2 + $0x3c8] sm:$0xff]  ;;  %v1959_v23 = vpack.c.bf16 %v507_v12, %v506_v11 }
 0x108   : > { %382 = vst.msk [vmem:[#allocation2 + $0x6] sm:$0x3] %vm2564_vm2, %v380_v15  ;;  %415 = vst.msk [vmem:[#allocation2 + $0xe] sm:$0x3] %vm2564_vm2, %v413_v16  ;;  %v1957_v15 = vpack.c.bf16 %v489_v6, %v488_v5  ;;  %v1989_v16 = vpack.c.bf16 %v521_v10, %v520_v9  ;;  %v1991_v24 = vpack.c.bf16 %v539_v14, %v538_v13  ;;  %v496_v0 = vld [vmem:[%s3291_s2 + $0x270] sm:$0xff]  ;;  %v529_v6 = vld [vmem:[%s3291_s2 + $0x378] sm:$0xff] }
 0x109   : > { %v528_v5 = vld [vmem:[%s3291_s2 + $0x370] sm:$0xff]  ;;  %v594_v9 = vld [vmem:[%s3291_s2 + $0x580] sm:$0xff]  ;;  %v595_v10 = vld [vmem:[%s3291_s2 + $0x588] sm:$0xff]  ;;  %v1973_v11 = vpack.c.bf16 %v497_v2, %v496_v0  ;;  %v694_v13 = vsub.s32 4, %v2561_v59 }
 0x10a   : > { %v2005_v12 = vpack.c.bf16 %v529_v6, %v528_v5  ;;  %v569_v54 = vld [vmem:[%s3291_s2 + $0x4b8] sm:$0xff]  ;;  %v600_v55 = vld [vmem:[%s3291_s2 + $0x5b0] sm:$0xff]  ;;  %v571_v5 = vld [vmem:[%s3291_s2 + $0x4c8] sm:$0xff] }
 0x10b   : > { %v584_v0 = vld [vmem:[%s3291_s2 + $0x530] sm:$0xff]  ;;  %v602_v6 = vld [vmem:[%s3291_s2 + $0x5c0] sm:$0xff] }
 0x10c   : > { %v1321_v59 = vld [vmem:[%s3292_s3 + $0x10] sm:$0xff] }
 0x10f   : > { %v2607_v28 = vld [vmem:[#allocation2] sm:$0xff]  ;;  %v2644_v44 = vld [vmem:[#allocation2 + $0x8] sm:$0xff] }
 0x110   : > { %v683_v35 = vrot.slane %v2607_v28, %v682_v17  ;;  %v691_v36 = vrot.slane %v2607_v28, %v690_v19  ;;  %v679_v37 = vrot.slane %v2607_v28, %v678_v20  ;;  %v687_v38 = vrot.slane %v2607_v28, %v686_v21 }
 0x111   : > { %v699_v50 = vrot.slane %v2607_v28, %v698_v25  ;;  %v707_v51 = vrot.slane %v2607_v28, %v706_v31  ;;  %v2670_v56 = vrot.slane %v2644_v44, %v702_v34  ;;  %v695_v32 = vrot.slane %v2607_v28, %v694_v13 }
 0x112   : > { %820 = vmatprep.mubr.f32.mxu1 %v683_v35  ;;  %890 = vmatprep.mubr.f32.mxu0 %v691_v36  ;;  %v1961_v35 = vpack.c.bf16 %v491_v22, %v490_v18  ;;  %v1993_v36 = vpack.c.bf16 %v523_v27, %v522_v26  ;;  %v547_v18 = vld [vmem:[%s3291_s2 + $0x408] sm:$0xff]  ;;  %v578_v22 = vld [vmem:[%s3291_s2 + $0x500] sm:$0xff]  ;;  %v565_v26 = vld [vmem:[%s3291_s2 + $0x498] sm:$0xff]  ;;  %v703_v33 = vrot.slane %v2607_v28, %v702_v34 }
 0x113   : > { %821 = vmatmul.mubr.f32.vlgmr.msra.gmra.mrb[0].mxu1 %v679_v37  ;;  %891 = vmatmul.mubr.f32.vlgmr.msra.gmra.mrb[2].mxu0 %v687_v38  ;;  %v492_v37 = vld [vmem:[%s3291_s2 + $0x250] sm:$0xff]  ;;  %v493_v38 = vld [vmem:[%s3291_s2 + $0x258] sm:$0xff] }
 0x114   : > { %1946 = vmatpush3.bf16.msra.mxu1 %v1945_v29  ;;  %1978 = vmatpush3.bf16.msra.mxu0 %v1977_v30  ;;  %v508_v29 = vld [vmem:[%s3291_s2 + $0x2d0] sm:$0xff]  ;;  %v509_v30 = vld [vmem:[%s3291_s2 + $0x2d8] sm:$0xff]  ;;  %v1965_v48 = vpack.c.bf16 %v493_v38, %v492_v37 }
 0x115   : > { %960 = vmatprep.mubr.f32.mxu1 %v699_v50  ;;  %1030 = vmatprep.mubr.f32.mxu0 %v707_v51  ;;  %v1963_v39 = vpack.c.bf16 %v509_v30, %v508_v29  ;;  %v494_v50 = vld [vmem:[%s3291_s2 + $0x260] sm:$0xff]  ;;  %v495_v51 = vld [vmem:[%s3291_s2 + $0x268] sm:$0xff]  ;;  %v596_v27 = vld [vmem:[%s3291_s2 + $0x590] sm:$0xff] }
 0x116   : > { %1948 = vmatprep.subr.bf16.mxu1 %v1947_v45  ;;  %1980 = vmatprep.subr.bf16.mxu0 %v1979_v46  ;;  %v511_v45 = vld [vmem:[%s3291_s2 + $0x2e8] sm:$0xff]  ;;  %v542_v46 = vld [vmem:[%s3291_s2 + $0x3e0] sm:$0xff]  ;;  %v1969_v62 = vpack.c.bf16 %v495_v51, %v494_v50  ;;  %v597_v29 = vld [vmem:[%s3291_s2 + $0x598] sm:$0xff] }
 0x117   : > { %v549_v37 = vld [vmem:[%s3291_s2 + $0x418] sm:$0xff]  ;;  %v580_v38 = vld [vmem:[%s3291_s2 + $0x510] sm:$0xff]  ;;  %v2043_v34 = vpack.c.bf16 %v597_v29, %v596_v27  ;;  %v582_v50 = vld [vmem:[%s3291_s2 + $0x520] sm:$0xff] }
 0x118   : > { %1950 = vmatpush3.bf16.msra.mxu1 %v1949_v52  ;;  %1982 = vmatpush3.bf16.msra.mxu0 %v1981_v53  ;;  %v1967_v52 = vpack.c.bf16 %v511_v45, %v510_v43  ;;  %v1999_v53 = vpack.c.bf16 %v543_v47, %v542_v46  ;;  %v598_v43 = vld [vmem:[%s3291_s2 + $0x5a0] sm:$0xff]  ;;  %v599_v45 = vld [vmem:[%s3291_s2 + $0x5a8] sm:$0xff] }
 0x119   : > { %1952 = vmatprep.subr.bf16.mxu1 %v1951_v57  ;;  %1984 = vmatprep.subr.bf16.mxu0 %v1983_v58  ;;  %v512_v57 = vld [vmem:[%s3291_s2 + $0x2f0] sm:$0xff]  ;;  %v513_v58 = vld [vmem:[%s3291_s2 + $0x2f8] sm:$0xff]  ;;  %v2047_v51 = vpack.c.bf16 %v599_v45, %v598_v43  ;;  %v590_v43 = vld [vmem:[%s3291_s2 + $0x560] sm:$0xff] }
 0x11c   : > { %1954 = vmatpush3.bf16.msra.mxu1 %v1953_v3  ;;  %1986 = vmatpush3.bf16.msra.mxu0 %v1985_v4  ;;  %v1971_v3 = vpack.c.bf16 %v513_v58, %v512_v57  ;;  %v2003_v4 = vpack.c.bf16 %v545_v61, %v544_v60  ;;  %v601_v57 = vld [vmem:[%s3291_s2 + $0x5b8] sm:$0xff] }
 0x11d   : > { %1956 = vmatprep.subr.bf16.mxu1 %v1955_v7  ;;  %1988 = vmatprep.subr.bf16.mxu0 %v1987_v8  ;;  %v562_v7 = vld [vmem:[%s3291_s2 + $0x480] sm:$0xff]  ;;  %v563_v8 = vld [vmem:[%s3291_s2 + $0x488] sm:$0xff]  ;;  %v2051_v2 = vpack.c.bf16 %v601_v57, %v600_v55  ;;  %v592_v55 = vld [vmem:[%s3291_s2 + $0x570] sm:$0xff] }
 0x11e   : > { %v2007_v14 = vpack.c.bf16 %v563_v8, %v562_v7  ;;  %v603_v7 = vld [vmem:[%s3291_s2 + $0x5c8] sm:$0xff] }
 0x120   : > { %1958 = vmatpush3.bf16.msra.mxu1 %v1957_v15  ;;  %1990 = vmatpush3.bf16.msra.mxu0 %v1989_v16  ;;  %v2039_v15 = vpack.c.bf16 %v595_v10, %v594_v9  ;;  %v546_v16 = vld [vmem:[%s3291_s2 + $0x400] sm:$0xff] }
 0x121   : > { %1960 = vmatprep.subr.bf16.mxu1 %v1959_v23  ;;  %1992 = vmatprep.subr.bf16.mxu0 %v1991_v24  ;;  %v579_v23 = vld [vmem:[%s3291_s2 + $0x508] sm:$0xff]  ;;  %v564_v24 = vld [vmem:[%s3291_s2 + $0x490] sm:$0xff]  ;;  %v2009_v30 = vpack.c.bf16 %v547_v18, %v546_v16 }
 0x122   : > { %v2011_v28 = vpack.c.bf16 %v565_v26, %v564_v24  ;;  %v587_v16 = vld [vmem:[%s3291_s2 + $0x548] sm:$0xff]  ;;  %v572_v18 = vld [vmem:[%s3291_s2 + $0x4d0] sm:$0xff]  ;;  %v605_v24 = vld [vmem:[%s3291_s2 + $0x5d8] sm:$0xff] }
 0x124   : > { %1962 = vmatpush3.bf16.msra.mxu1 %v1961_v35  ;;  %1994 = vmatpush3.bf16.msra.mxu0 %v1993_v36  ;;  %v2041_v35 = vpack.c.bf16 %v579_v23, %v578_v22  ;;  %v548_v36 = vld [vmem:[%s3291_s2 + $0x410] sm:$0xff]  ;;  %v573_v22 = vld [vmem:[%s3291_s2 + $0x4d8] sm:$0xff] }
 0x125   : > { %1964 = vmatprep.subr.bf16.mxu1 %v1963_v39  ;;  %1996 = vmatprep.subr.bf16.mxu0 %v1995_v40  ;;  %v715_v39 = vrot.slane %v2644_v44, %v682_v17  ;;  %v581_v40 = vld [vmem:[%s3291_s2 + $0x518] sm:$0xff]  ;;  %v723_v17 = vrot.slane %v2644_v44, %v690_v19  ;;  %v2013_v46 = vpack.c.bf16 %v549_v37, %v548_v36  ;;  %v551_v19 = vld [vmem:[%s3291_s2 + $0x428] sm:$0xff]  ;;  %v604_v23 = vld [vmem:[%s3291_s2 + $0x5d0] sm:$0xff] }
 0x126   : > { %v2045_v47 = vpack.c.bf16 %v581_v40, %v580_v38  ;;  %v2027_v29 = vpack.c.bf16 %v573_v22, %v572_v18  ;;  %v589_v36 = vld [vmem:[%s3291_s2 + $0x558] sm:$0xff]  ;;  %v574_v37 = vld [vmem:[%s3291_s2 + $0x4e0] sm:$0xff]  ;;  %v575_v38 = vld [vmem:[%s3291_s2 + $0x4e8] sm:$0xff] }
 0x127   : > { %v612_v18 = vld [vmem:[%s3291_s2 + $0x610] sm:$0xff]  ;;  %v613_v22 = vld [vmem:[%s3291_s2 + $0x618] sm:$0xff] }
 0x128   : > { %1966 = vmatpush3.bf16.msra.mxu1 %v1965_v48  ;;  %1998 = vmatpush3.bf16.msra.mxu0 %v1997_v49  ;;  %v2015_v48 = vpack.c.bf16 %v567_v42, %v566_v41  ;;  %v550_v49 = vld [vmem:[%s3291_s2 + $0x420] sm:$0xff]  ;;  %v2031_v41 = vpack.c.bf16 %v575_v38, %v574_v37 }
 0x129   : > { %1968 = vmatprep.subr.bf16.mxu1 %v1967_v52  ;;  %2000 = vmatprep.subr.bf16.mxu0 %v1999_v53  ;;  %v583_v52 = vld [vmem:[%s3291_s2 + $0x528] sm:$0xff]  ;;  %v568_v53 = vld [vmem:[%s3291_s2 + $0x4b0] sm:$0xff]  ;;  %v2017_v58 = vpack.c.bf16 %v551_v19, %v550_v49  ;;  %v558_v42 = vld [vmem:[%s3291_s2 + $0x460] sm:$0xff] }
 0x12a   : > { %v2049_v60 = vpack.c.bf16 %v583_v52, %v582_v50  ;;  %v2019_v61 = vpack.c.bf16 %v569_v54, %v568_v53  ;;  %v608_v49 = vld [vmem:[%s3291_s2 + $0x5f0] sm:$0xff]  ;;  %v609_v19 = vld [vmem:[%s3291_s2 + $0x5f8] sm:$0xff]  ;;  %v614_v38 = vld [vmem:[%s3291_s2 + $0x620] sm:$0xff] }
 0x12b   : > { %v560_v53 = vld [vmem:[%s3291_s2 + $0x470] sm:$0xff]  ;;  %v561_v54 = vld [vmem:[%s3291_s2 + $0x478] sm:$0xff]  ;;  %v2067_v57 = vpack.c.bf16 %v609_v19, %v608_v49 }
 0x12c   : > { %1970 = vmatpush3.bf16.msra.mxu1 %v1969_v62  ;;  %2002 = vmatpush3.bf16.msra.mxu0 %v2001_v63  ;;  %v552_v62 = vld [vmem:[%s3291_s2 + $0x430] sm:$0xff]  ;;  %v553_v63 = vld [vmem:[%s3291_s2 + $0x438] sm:$0xff] }
 0x12d   : > { %1972 = vmatprep.subr.bf16.mxu1 %v1971_v3  ;;  %2004 = vmatprep.subr.bf16.mxu0 %v2003_v4  ;;  %v585_v3 = vld [vmem:[%s3291_s2 + $0x538] sm:$0xff]  ;;  %v570_v4 = vld [vmem:[%s3291_s2 + $0x4c0] sm:$0xff]  ;;  %v2021_v8 = vpack.c.bf16 %v553_v63, %v552_v62  ;;  %v659_v63 = vld [vmem:[%s3291_s2 + $0x788] sm:$0xff] }
 0x12e   : > { %v2053_v9 = vpack.c.bf16 %v585_v3, %v584_v0  ;;  %v2023_v10 = vpack.c.bf16 %v571_v5, %v570_v4  ;;  %v658_v62 = vld [vmem:[%s3291_s2 + $0x780] sm:$0xff]  ;;  %v2037_v0 = vpack.c.bf16 %v561_v54, %v560_v53  ;;  %v611_v5 = vld [vmem:[%s3291_s2 + $0x608] sm:$0xff]  ;;  %v648_v49 = vld [vmem:[%s3291_s2 + $0x730] sm:$0xff] }
 0x12f   : > { %v610_v4 = vld [vmem:[%s3291_s2 + $0x600] sm:$0xff]  ;;  %v667_v54 = vld [vmem:[%s3291_s2 + $0x7c8] sm:$0xff] }
 0x130   : > { %1974 = vmatpush3.bf16.msra.mxu1 %v1973_v11  ;;  %2006 = vmatpush3.bf16.msra.mxu0 %v2005_v12  ;;  %v554_v11 = vld [vmem:[%s3291_s2 + $0x440] sm:$0xff]  ;;  %v555_v12 = vld [vmem:[%s3291_s2 + $0x448] sm:$0xff] }
 0x131   : > { %2008 = vmatprep.subr.bf16.mxu1 %v2007_v14  ;;  %2040 = vmatprep.subr.bf16.mxu0 %v2039_v15  ;;  %v586_v14 = vld [vmem:[%s3291_s2 + $0x540] sm:$0xff]  ;;  %v2055_v15 = vpack.c.bf16 %v603_v7, %v602_v6  ;;  %v2025_v26 = vpack.c.bf16 %v555_v12, %v554_v11  ;;  %v2103_v6 = vpack.c.bf16 %v659_v63, %v658_v62  ;;  %v660_v12 = vld [vmem:[%s3291_s2 + $0x790] sm:$0xff] }
 0x132   : > { %v2057_v27 = vpack.c.bf16 %v587_v16, %v586_v14  ;;  %v642_v7 = vld [vmem:[%s3291_s2 + $0x700] sm:$0xff]  ;;  %v2073_v11 = vpack.c.bf16 %v611_v5, %v610_v4  ;;  %v661_v14 = vld [vmem:[%s3291_s2 + $0x798] sm:$0xff]  ;;  %v668_v4 = vld [vmem:[%s3291_s2 + $0x7d0] sm:$0xff] }
 0x133   : > { %961 = vmatmul.mubr.f32.vlgmr.msra.gmra.mrb[2].mxu1 %v695_v32  ;;  %1031 = vmatmul.mubr.f32.vlgmr.msra.gmra.mrb[4].mxu0 %v703_v33  ;;  %v557_v32 = vld [vmem:[%s3291_s2 + $0x458] sm:$0xff]  ;;  %v588_v33 = vld [vmem:[%s3291_s2 + $0x550] sm:$0xff]  ;;  %v666_v53 = vld [vmem:[%s3291_s2 + $0x7c0] sm:$0xff] }
 0x134   : > { %2010 = vmatpush3.bf16.msra.mxu1 %v2009_v30  ;;  %1100 = vmatprep.mubr.f32.mxu1 %v715_v39  ;;  %v556_v30 = vld [vmem:[%s3291_s2 + $0x450] sm:$0xff]  ;;  %v606_v39 = vld [vmem:[%s3291_s2 + $0x5e0] sm:$0xff]  ;;  %v2061_v40 = vpack.c.bf16 %v589_v36, %v588_v33  ;;  %v663_v33 = vld [vmem:[%s3291_s2 + $0x7a8] sm:$0xff]  ;;  %v2077_v36 = vpack.c.bf16 %v613_v22, %v612_v18  ;;  %v2119_v63 = vpack.c.bf16 %v667_v54, %v666_v53 }
 0x135   : > { %2042 = vmatpush3.bf16.msra.mxu0 %v2041_v35  ;;  %1170 = vmatprep.mubr.f32.mxu0 %v723_v17  ;;  %v2059_v35 = vpack.c.bf16 %v605_v24, %v604_v23  ;;  %v559_v17 = vld [vmem:[%s3291_s2 + $0x468] sm:$0xff]  ;;  %v644_v23 = vld [vmem:[%s3291_s2 + $0x710] sm:$0xff]  ;;  %v719_v24 = vrot.slane %v2644_v44, %v686_v21  ;;  %v2107_v21 = vpack.c.bf16 %v661_v14, %v660_v12  ;;  %v650_v62 = vld [vmem:[%s3291_s2 + $0x740] sm:$0xff] }
 0x136   : > { %2012 = vmatprep.subr.bf16.mxu1 %v2011_v28  ;;  %2044 = vmatprep.subr.bf16.mxu0 %v2043_v34  ;;  %v607_v28 = vld [vmem:[%s3291_s2 + $0x5e8] sm:$0xff]  ;;  %v2029_v34 = vpack.c.bf16 %v557_v32, %v556_v30  ;;  %v2033_v50 = vpack.c.bf16 %v559_v17, %v558_v42  ;;  %v731_v30 = vrot.slane %v2644_v44, %v698_v25  ;;  %v662_v32 = vld [vmem:[%s3291_s2 + $0x7a0] sm:$0xff]  ;;  %v664_v42 = vld [vmem:[%s3291_s2 + $0x7b0] sm:$0xff] }
 0x137   : > { %v2063_v45 = vpack.c.bf16 %v607_v28, %v606_v39  ;;  %v615_v39 = vld [vmem:[%s3291_s2 + $0x628] sm:$0xff]  ;;  %v646_v28 = vld [vmem:[%s3291_s2 + $0x720] sm:$0xff]  ;;  %v665_v17 = vld [vmem:[%s3291_s2 + $0x7b8] sm:$0xff] }
 0x138   : > { %2014 = vmatpush3.bf16.msra.mxu1 %v2013_v46  ;;  %v591_v46 = vld [vmem:[%s3291_s2 + $0x568] sm:$0xff]  ;;  %v2115_v19 = vpack.c.bf16 %v665_v17, %v664_v42  ;;  %v669_v5 = vld [vmem:[%s3291_s2 + $0x7d8] sm:$0xff]  ;;  %v670_v18 = vld [vmem:[%s3291_s2 + $0x7e0] sm:$0xff]  ;;  %v727_v17 = vrot.slane %v2644_v44, %v694_v13 }
 0x139   : > { %2046 = vmatpush3.bf16.msra.mxu0 %v2045_v47  ;;  %2016 = vmatprep.subr.bf16.mxu1 %v2015_v48  ;;  %v576_v47 = vld [vmem:[%s3291_s2 + $0x4f0] sm:$0xff]  ;;  %v577_v48 = vld [vmem:[%s3291_s2 + $0x4f8] sm:$0xff]  ;;  %v2123_v12 = vpack.c.bf16 %v669_v5, %v668_v4  ;;  %v671_v22 = vld [vmem:[%s3291_s2 + $0x7e8] sm:$0xff] }
 0x13a   : > { %2048 = vmatprep.subr.bf16.mxu0 %v2047_v51  ;;  %v2065_v51 = vpack.c.bf16 %v591_v46, %v590_v43  ;;  %v2035_v52 = vpack.c.bf16 %v577_v48, %v576_v47  ;;  %v2081_v43 = vpack.c.bf16 %v615_v39, %v614_v38  ;;  %v616_v47 = vld [vmem:[%s3291_s2 + $0x630] sm:$0xff]  ;;  %v617_v48 = vld [vmem:[%s3291_s2 + $0x638] sm:$0xff] }
 0x13b   : > { %v653_v14 = vld [vmem:[%s3291_s2 + $0x758] sm:$0xff]  ;;  %v624_v39 = vld [vmem:[%s3291_s2 + $0x670] sm:$0xff] }
 0x13c   : > { %2018 = vmatpush3.bf16.msra.mxu1 %v2017_v58  ;;  %v593_v58 = vld [vmem:[%s3291_s2 + $0x578] sm:$0xff] }
 0x13d   : > { %2050 = vmatpush3.bf16.msra.mxu0 %v2049_v60  ;;  %2020 = vmatprep.subr.bf16.mxu1 %v2019_v61  ;;  %v626_v60 = vld [vmem:[%s3291_s2 + $0x680] sm:$0xff]  ;;  %v627_v61 = vld [vmem:[%s3291_s2 + $0x688] sm:$0xff] }
 0x13e   : > { %2052 = vmatprep.subr.bf16.mxu0 %v2051_v2  ;;  %v2069_v2 = vpack.c.bf16 %v593_v58, %v592_v55  ;;  %v2071_v3 = vpack.c.bf16 %v627_v61, %v626_v60  ;;  %v2085_v55 = vpack.c.bf16 %v617_v48, %v616_v47  ;;  %v618_v60 = vld [vmem:[%s3291_s2 + $0x640] sm:$0xff]  ;;  %v619_v61 = vld [vmem:[%s3291_s2 + $0x648] sm:$0xff] }
 0x140   : > { %2022 = vmatpush3.bf16.msra.mxu1 %v2021_v8  ;;  %v643_v8 = vld [vmem:[%s3291_s2 + $0x708] sm:$0xff] }
 0x141   : > { %2054 = vmatpush3.bf16.msra.mxu0 %v2053_v9  ;;  %2024 = vmatprep.subr.bf16.mxu1 %v2023_v10  ;;  %v628_v9 = vld [vmem:[%s3291_s2 + $0x690] sm:$0xff]  ;;  %v629_v10 = vld [vmem:[%s3291_s2 + $0x698] sm:$0xff]  ;;  %v2105_v16 = vpack.c.bf16 %v643_v8, %v642_v7 }
 0x142   : > { %2056 = vmatprep.subr.bf16.mxu0 %v2055_v15  ;;  %v711_v15 = vrot.slane %v2644_v44, %v678_v20  ;;  %v2075_v20 = vpack.c.bf16 %v629_v10, %v628_v9  ;;  %v620_v9 = vld [vmem:[%s3291_s2 + $0x650] sm:$0xff]  ;;  %v621_v10 = vld [vmem:[%s3291_s2 + $0x658] sm:$0xff] }
 0x144   : > { %2026 = vmatpush3.bf16.msra.mxu1 %v2025_v26  ;;  %v645_v26 = vld [vmem:[%s3291_s2 + $0x718] sm:$0xff] }
 0x145   : > { %2058 = vmatpush3.bf16.msra.mxu0 %v2057_v27  ;;  %2028 = vmatprep.subr.bf16.mxu1 %v2027_v29  ;;  %v630_v27 = vld [vmem:[%s3291_s2 + $0x6a0] sm:$0xff]  ;;  %v631_v29 = vld [vmem:[%s3291_s2 + $0x6a8] sm:$0xff]  ;;  %v2109_v37 = vpack.c.bf16 %v645_v26, %v644_v23  ;;  %v2093_v23 = vpack.c.bf16 %v621_v10, %v620_v9 }
 0x146   : > { %2060 = vmatprep.subr.bf16.mxu0 %v2059_v35  ;;  %v739_v35 = vrot.slane %v2644_v44, %v706_v31  ;;  %v2079_v25 = vpack.c.bf16 %v631_v29, %v630_v27  ;;  %v2111_v31 = vpack.c.bf16 %v663_v33, %v662_v32  ;;  %v622_v26 = vld [vmem:[%s3291_s2 + $0x660] sm:$0xff]  ;;  %v623_v27 = vld [vmem:[%s3291_s2 + $0x668] sm:$0xff]  ;;  %v640_v32 = vld [vmem:[%s3291_s2 + $0x6f0] sm:$0xff] }
 0x147   : > { %v654_v29 = vld [vmem:[%s3291_s2 + $0x760] sm:$0xff]  ;;  %v641_v33 = vld [vmem:[%s3291_s2 + $0x6f8] sm:$0xff] }
 0x148   : > { %2030 = vmatpush3.bf16.msra.mxu1 %v2029_v34  ;;  %v647_v34 = vld [vmem:[%s3291_s2 + $0x728] sm:$0xff]  ;;  %v2099_v38 = vpack.c.bf16 %v641_v33, %v640_v32  ;;  %v1322_v44 = vld [vmem:[%s3292_s3 + $0x18] sm:$0xff] }
 0x149   : > { %2062 = vmatpush3.bf16.msra.mxu0 %v2061_v40  ;;  %2032 = vmatprep.subr.bf16.mxu1 %v2031_v41  ;;  %v632_v40 = vld [vmem:[%s3291_s2 + $0x6b0] sm:$0xff]  ;;  %v633_v41 = vld [vmem:[%s3291_s2 + $0x6b8] sm:$0xff] }
 0x14a   : > { %2064 = vmatprep.subr.bf16.mxu0 %v2063_v45  ;;  %v2113_v45 = vpack.c.bf16 %v647_v34, %v646_v28  ;;  %v2083_v46 = vpack.c.bf16 %v633_v41, %v632_v40  ;;  %v625_v28 = vld [vmem:[%s3291_s2 + $0x678] sm:$0xff]  ;;  %v656_v34 = vld [vmem:[%s3291_s2 + $0x770] sm:$0xff] }
 0x14b   : > { %v657_v40 = vld [vmem:[%s3291_s2 + $0x778] sm:$0xff]  ;;  %v2101_v41 = vpack.c.bf16 %v625_v28, %v624_v39 }
 0x14c   : > { %2034 = vmatpush3.bf16.msra.mxu1 %v2033_v50  ;;  %v649_v50 = vld [vmem:[%s3291_s2 + $0x738] sm:$0xff]  ;;  %v2133_v42 = vpack.c.bf16 %v657_v40, %v656_v34 }
 0x14d   : > { %2066 = vmatpush3.bf16.msra.mxu0 %v2065_v51  ;;  %2036 = vmatprep.subr.bf16.mxu1 %v2035_v52  ;;  %v634_v51 = vld [vmem:[%s3291_s2 + $0x6c0] sm:$0xff]  ;;  %v635_v52 = vld [vmem:[%s3291_s2 + $0x6c8] sm:$0xff] }
 0x14e   : > { %2068 = vmatprep.subr.bf16.mxu0 %v2067_v57  ;;  %v2117_v57 = vpack.c.bf16 %v649_v50, %v648_v49  ;;  %v2087_v58 = vpack.c.bf16 %v635_v52, %v634_v51 }
 0x150   : > { %2038 = vmatpush3.bf16.msra.mxu1 %v2037_v0  ;;  %v651_v0 = vld [vmem:[%s3291_s2 + $0x748] sm:$0xff] }
 0x151   : > { %2070 = vmatpush3.bf16.msra.mxu0 %v2069_v2  ;;  %2072 = vmatprep.subr.bf16.mxu1 %v2071_v3  ;;  %v636_v2 = vld [vmem:[%s3291_s2 + $0x6d0] sm:$0xff]  ;;  %v637_v3 = vld [vmem:[%s3291_s2 + $0x6d8] sm:$0xff]  ;;  %v2121_v7 = vpack.c.bf16 %v651_v0, %v650_v62 }
 0x152   : > { %2104 = vmatprep.subr.bf16.mxu0 %v2103_v6  ;;  %v2089_v6 = vpack.c.bf16 %v619_v61, %v618_v60  ;;  %v2091_v8 = vpack.c.bf16 %v637_v3, %v636_v2 }
 0x153   : > { %1101 = vmatmul.mubr.f32.vlgmr.msra.gmra.mrb[4].mxu1 %v711_v15  ;;  %v638_v15 = vld [vmem:[%s3291_s2 + $0x6e0] sm:$0xff] }
 0x154   : > { %1171 = vmatmul.mubr.f32.vlgmr.msra.gmra.mrb[6].mxu0 %v719_v24  ;;  %2074 = vmatpush3.bf16.msra.mxu1 %v2073_v11  ;;  %v652_v11 = vld [vmem:[%s3291_s2 + $0x750] sm:$0xff] }
 0x155   : > { %1240 = vmatprep.mubr.f32.mxu1 %v731_v30  ;;  %2106 = vmatpush3.bf16.msra.mxu0 %v2105_v16  ;;  %v639_v16 = vld [vmem:[%s3291_s2 + $0x6e8] sm:$0xff]  ;;  %v2125_v24 = vpack.c.bf16 %v653_v14, %v652_v11  ;;  %v2127_v30 = vpack.c.bf16 %v671_v22, %v670_v18  ;;  %v1398_v14 = vld [vmem:[%s3293_s4] sm:$0xff] }
 0x156   : > { %1310 = vmatprep.mubr.f32.mxu0 %v739_v35  ;;  %2076 = vmatprep.subr.bf16.mxu1 %v2075_v20  ;;  %v2095_v20 = vpack.c.bf16 %v639_v16, %v638_v15  ;;  %v672_v35 = vld [vmem:[%s3291_s2 + $0x7f0] sm:$0xff]  ;;  %v1399_v15 = vld [vmem:[%s3293_s4 + $0x8] sm:$0xff] }
 0x157   : > { %2108 = vmatprep.subr.bf16.mxu0 %v2107_v21  ;;  %v655_v21 = vld [vmem:[%s3291_s2 + $0x768] sm:$0xff]  ;;  %v2142_v22 = vpack.c.bf16 %v1399_v15, %v1398_v14 }
 0x158   : > { %2078 = vmatpush3.bf16.msra.mxu1 %v2077_v36  ;;  %v673_v36 = vld [vmem:[%s3291_s2 + $0x7f8] sm:$0xff] }
 0x159   : > { %2110 = vmatpush3.bf16.msra.mxu0 %v2109_v37  ;;  %2080 = vmatprep.subr.bf16.mxu1 %v2079_v25  ;;  %v2097_v37 = vpack.c.bf16 %v623_v27, %v622_v26  ;;  %v2129_v25 = vpack.c.bf16 %v655_v21, %v654_v29 }
 0x15a   : > { %2112 = vmatprep.subr.bf16.mxu0 %v2111_v31  ;;  %v2131_v31 = vpack.c.bf16 %v673_v36, %v672_v35 }
 0x15c   : > { %2082 = vmatpush3.bf16.msra.mxu1 %v2081_v43  ;;  %v2260_v43 = vmov 0.0|0.0  }
 0x15d   : > { %2114 = vmatpush3.bf16.msra.mxu0 %v2113_v45  ;;  %2084 = vmatprep.subr.bf16.mxu1 %v2083_v46  ;;  %v1319_v45 = vld [vmem:[%s3292_s3] sm:$0xff]  ;;  %v1320_v46 = vld [vmem:[%s3292_s3 + $0x8] sm:$0xff] }
 0x15e   : > { %2116 = vmatprep.subr.bf16.mxu0 %v2115_v19  ;;  %v2136_v47 = vpack.c.bf16 %v1320_v46, %v1319_v45 }
 0x160   : > { %2086 = vmatpush3.bf16.msra.mxu1 %v2085_v55 }
 0x161   : > { %2118 = vmatpush3.bf16.msra.mxu0 %v2117_v57  ;;  %2088 = vmatprep.subr.bf16.mxu1 %v2087_v58 }
 0x162   : > { %2120 = vmatprep.subr.bf16.mxu0 %v2119_v63 }
 0x164   : > { %2090 = vmatpush3.bf16.msra.mxu1 %v2089_v6 }
 0x165   : > { %2122 = vmatpush3.bf16.msra.mxu0 %v2121_v7  ;;  %2092 = vmatprep.subr.bf16.mxu1 %v2091_v8 }
 0x166   : > { %2124 = vmatprep.subr.bf16.mxu0 %v2123_v12 }
 0x168   : > { %2094 = vmatpush3.bf16.msra.mxu1 %v2093_v23 }
 0x169   : > { %2126 = vmatpush3.bf16.msra.mxu0 %v2125_v24  ;;  %2096 = vmatprep.subr.bf16.mxu1 %v2095_v20  ;;  %v1400_v24 = vld [vmem:[%s3293_s4 + $0x10] sm:$0xff]  ;;  %v1401_v20 = vld [vmem:[%s3293_s4 + $0x18] sm:$0xff] }
 0x16a   : > { %2128 = vmatprep.subr.bf16.mxu0 %v2127_v30  ;;  %v2145_v26 = vpack.c.bf16 %v1401_v20, %v1400_v24  ;;  %v1318_v30 = vld [vmem:[%s3294_s5] sm:$0x1] }
 0x16c   : > { %2098 = vmatpush3.bf16.msra.mxu1 %v2097_v37 }
 0x16d   : > { %2130 = vmatpush3.bf16.msra.mxu0 %v2129_v25  ;;  %2100 = vmatprep.subr.bf16.mxu1 %v2099_v38 }
 0x16e   : > { %2132 = vmatprep.subr.bf16.mxu0 %v2131_v31 }
 0x170   : > { %2102 = vmatpush3.bf16.msra.mxu1 %v2101_v41 }
 0x171   : > { %2134 = vmatpush3.bf16.msra.mxu0 %v2133_v42  ;;  %2135 = vmatprep.subr.bf16.mxu1 %v2260_v43 }
 0x173   : > { %1241 = vmatmul.mubr.f32.vlgmr.msra.gmra.mrb[6].mxu1 %v727_v17 }
 0x174   : > { %1311 = vmatmul.mubr.f32.vlgmr.msra.gmra.mrb[8].mxu0 %v2670_v56  ;;  %2137 = vmatpush3.bf16.msra.mxu1 %v2136_v47  ;;  %v2139_v56 = vpack.c.bf16 %v1322_v44, %v1321_v59 }
 0x175   : > { %2138 = vmatprep.subr.bf16.mxu1 %v2260_v43  ;;  %1857 = vmatprep.mubr.msk.f32.mxu1 %vm2261_vm3, %v2258_v1 }
 0x178   : > { %2140 = vmatpush3.bf16.msra.mxu1 %v2139_v56 }
 0x179   : > { %2141 = vmatprep.subr.bf16.mxu1 %v2260_v43 }
 0x1e6   : > { %v1591_v13 = vpop.f32.mrb[0].mxu1  ;;  %v1626_v48 = vpop.f32.mrb[2].mxu0 }
 0x1e7   : > { %v1592_v49 = vpop.f32.mrb[1].mxu1  ;;  %v1627_v19 = vpop.f32.mrb[3].mxu0 }
 0x1e8   : > { %v1593_v50 = vadd.f32 %v1592_v49, %v1591_v13  ;;  %v1628_v51 = vadd.f32 %v1627_v19, %v1626_v48 }
 0x1ea   : > { %v893_v52 = vadd.f32 %v1628_v51, %v1593_v50 }
 0x206   : > { %v1661_v53 = vpop.f32.mrb[2].mxu1  ;;  %v1696_v54 = vpop.f32.mrb[4].mxu0 }
 0x207   : > { %v1662_v55 = vpop.f32.mrb[3].mxu1  ;;  %v1697_v57 = vpop.f32.mrb[5].mxu0 }
 0x208   : > { %v1663_v58 = vadd.f32 %v1662_v55, %v1661_v53  ;;  %v1698_v60 = vadd.f32 %v1697_v57, %v1696_v54 }
 0x20a   : > { %v963_v61 = vadd.f32 %v1663_v58, %v893_v52 }
 0x20c   : > { %v1033_v62 = vadd.f32 %v1698_v60, %v963_v61 }
 0x226   : > { %v1731_v63 = vpop.f32.mrb[4].mxu1 }
 0x227   : > { %v1766_v0 = vpop.f32.mrb[6].mxu0  ;;  %v1732_v2 = vpop.f32.mrb[5].mxu1 }
 0x228   : > { %v1733_v3 = vadd.f32 %v1732_v2, %v1731_v63  ;;  %v1767_v4 = vpop.f32.mrb[7].mxu0 }
 0x229   : > { %v1768_v5 = vadd.f32 %v1767_v4, %v1766_v0 }
 0x22a   : > { %v1103_v6 = vadd.f32 %v1733_v3, %v1033_v62 }
 0x22c   : > { %v1173_v7 = vadd.f32 %v1768_v5, %v1103_v6 }
 0x246   : > { %v1801_v8 = vpop.f32.mrb[6].mxu1 }
 0x247   : > { %v1836_v9 = vpop.f32.mrb[8].mxu0  ;;  %v1802_v10 = vpop.f32.mrb[7].mxu1 }
 0x248   : > { %v1803_v11 = vadd.f32 %v1802_v10, %v1801_v8  ;;  %v1837_v12 = vpop.f32.mrb[9].mxu0 }
 0x249   : > { %v1838_v16 = vadd.f32 %v1837_v12, %v1836_v9 }
 0x24a   : > { %v1243_v18 = vadd.f32 %v1803_v11, %v1173_v7 }
 0x24c   : > { %v1313_v23 = vadd.f32 %v1838_v16, %v1243_v18 }
 0x24e   : > { %1858 = vmatmul.mubr.msk.f32.vlgmr.msra.gmra.mrb[8].mxu1 %vm1323_vm4, %v1313_v23  ;;  %v1316_v27 = vmul.f32 %v1313_v23, %v1313_v23 }
 0x24f   : > { %2143 = vmatpush3.bf16.msra.mxu1 %v2142_v22  ;;  %1868 = vmatprep.mubr.msk.f32.mxu1 %vm2261_vm3, %v2258_v1 }
 0x250   : > { %2144 = vmatprep.subr.bf16.mxu1 %v2260_v43  ;;  %v1553_v29 = vadd.f32 -1.0, %v1316_v27 }
 0x253   : > { %2146 = vmatpush3.bf16.msra.mxu1 %v2145_v26 }
 0x256   : > { %1869 = vmatmul.mubr.msk.f32.vlgmr.msra.gmra.mrb[8].mxu1 %vm1323_vm4, %v1553_v29 }
 0x329   : > { %v1471_v21 = vpop.f32.mrb[8].mxu1 }
 0x32a   : > { %v2147_v32 = vadd.f32 %v1471_v21, %v1318_v30  ;;  %v1870_v33 = vpop.f32.mrb[9].mxu1 }
 0x32c   : > { %1476 = vst [vmem:[%s243_s29] sm:$0x1] %v2147_v32 }
 0x32d   : > { %2207 = shalt.err (!%p2204_p3)
}
 0x32e   : > { %s2208_s18 = scalar_lea.hbm %s3247_s12, 16  ;;  %s2212_s20 = scalar_lea.hbm %s3295_s6, 32 }
 0x32f   : > { %p2209_p4 = scmp.ne.s32.totalorder %s3247_s12, %s2208_s18  ;;  %p2213_p9 = scmp.lt.u32.totalorder %s3247_s12, %s3295_s6 }
 0x330   : > { %p2214_p10 = scmp.lt.u32.totalorder %s2212_s20, %s2208_s18  ;;  %p2216_p12 = scmp.lt.u32.totalorder %s2208_s18, %s3247_s12 }
 0x331   : > { %p2210_p7 = pnand %p2209_p4, %p2336_p5 }
 0x332   : > { %p2215_p11 = por %p2214_p10, %p2213_p9 }
 0x333   : > { %p2211_p8 = pneg %p2210_p7 }
 0x334   : > { %p2217_p13 = por %p2216_p12, %p2215_p11 }
 0x336   : > { %p2218_p0 = pnand %p2217_p13, %p2211_p8 }
 0x338   : > { %2221 = shalt.err (!%p2218_p0)
}
 0x339   : > { %2151 = dma.vmem_to_hbm [thread:$0]  (%p2336_p5), %s3249_s9, 16, %s3247_s12, %s1478_s14  }
 0x33a PF: > { %p2157_p1 = scmp.ge.s32.totalorder %s2256_s24, 2  ;;  %s1502_s29 = sand.u32 1, %s2244_s21  }
 0x33b   : > { %s1503_s10 = scalar_lea.sflag [#allocation4], %s1502_s29 }
 0x33c   : > { %p2154_p2 = pnand %p2157_p1, %p2340_p6 }
 0x33e   : > { %2239 = dma.done.wait (!%p2154_p2), %s1503_s10, 16  }
 0x33f   : > { %2241 = vsyncadd (!%p2154_p2), %s1503_s10, 4294967280  ;;  %p16_p3 = scmp.ge.s32.totalorder %s2323_s27, 4   ;;  %s3300_s21 = smov %s2248_s22 }
 0x340   : > { %s3301_s22 = smov %s2252_s23  ;;  %s3302_s23 = smov %s2334_s30 }
 0x341   : > { %s3303_s24 = smov %s2323_s27  ;;  %18 = sbr.rel (!%p16_p3) target bundleno = 3 (0x3), region = 79 }
 0x348   :  { %1507 = vsyncpa [#allocation4], 1 }
 0x349   :  { %1509 = vsyncpa [#allocation4 + $0x1], 1 }

</bundles_post_ra>
